<compile_context>
chip_gen: v7x
topology: tpu7x:2x2x1
jax: 0.10.0
libtpu: 0.0.40
codegen_flags: <defaults>
</compile_context>

<pallas_src>
import functools

import jax
import jax.numpy as jnp
from jax import lax
from jax.experimental import pallas as pl
from jax.experimental.pallas import tpu as pltpu

_VMEM_LIMIT = 48 * 1024 * 1024  # safe on v5e/v6e (128 MiB) and v7x (64 MiB)


def _pick_tile(n, target):
    """Largest multiple of 8 that divides n and is <= target, else n (full)."""
    t = min(target, n)
    t = (t // 8) * 8
    while t >= 8:
        if n % t == 0:
            return t
        t -= 8
    return n


def _cparams(semantics):
    return pltpu.CompilerParams(dimension_semantics=semantics,
                                vmem_limit_bytes=_VMEM_LIMIT)


# ---------------------------------------------------------------------------
# Kernel 1a: GAT transform — zh / residual / el / er for all heads at once
# ---------------------------------------------------------------------------
def _gat_transform_kernel(h_ref, w_ref, rw_ref, al_ref, ar_ref,
                          zh_ref, res_ref, el_ref, er_ref,
                          *, num_heads, out_feats, residual_identity):
    h = h_ref[...]                                             # [TR, Din]
    # one wide matmul for all heads (Din x H*F); tiny K -> keep f32 operands
    zh = jnp.dot(h, w_ref[...], preferred_element_type=jnp.float32)   # [TR, H*F]
    zh_ref[...] = zh
    if residual_identity:
        res_ref[...] = h                                       # Identity residual
    else:
        res_ref[...] = jnp.dot(h, rw_ref[...],
                               preferred_element_type=jnp.float32)
    al = al_ref[...]                                           # [1, H*F]
    ar = ar_ref[...]
    els, ers = [], []
    for hd in range(num_heads):                                # static small loop
        sl = slice(hd * out_feats, (hd + 1) * out_feats)
        zh_h = zh[:, sl]
        els.append(jnp.sum(zh_h * al[:, sl], axis=-1, keepdims=True))
        ers.append(jnp.sum(zh_h * ar[:, sl], axis=-1, keepdims=True))
    el_ref[...] = jnp.concatenate(els, axis=-1)                # [TR, H]
    er_ref[...] = jnp.concatenate(ers, axis=-1)                # [TR, H]


def gat_transform(h, w_flat, rw_flat, al, ar, *, num_heads, out_feats,
                  residual_identity, row_tile):
    N, Din = h.shape
    HF = num_heads * out_feats
    TR = _pick_tile(N, row_tile)
    kern = functools.partial(_gat_transform_kernel, num_heads=num_heads,
                             out_feats=out_feats,
                             residual_identity=residual_identity)
    return pl.pallas_call(
        kern,
        grid=(N // TR,),
        out_shape=(jax.ShapeDtypeStruct((N, HF), jnp.float32),
                   jax.ShapeDtypeStruct((N, HF), jnp.float32),
                   jax.ShapeDtypeStruct((N, num_heads), jnp.float32),
                   jax.ShapeDtypeStruct((N, num_heads), jnp.float32)),
        in_specs=[pl.BlockSpec((TR, Din), lambda i: (i, 0)),
                  pl.BlockSpec((Din, HF), lambda i: (0, 0)),
                  pl.BlockSpec((Din, HF), lambda i: (0, 0)),
                  pl.BlockSpec((1, HF), lambda i: (0, 0)),
                  pl.BlockSpec((1, HF), lambda i: (0, 0))],
        out_specs=(pl.BlockSpec((TR, HF), lambda i: (i, 0)),
                   pl.BlockSpec((TR, HF), lambda i: (i, 0)),
                   pl.BlockSpec((TR, num_heads), lambda i: (i, 0)),
                   pl.BlockSpec((TR, num_heads), lambda i: (i, 0))),
        compiler_params=_cparams(("parallel",)),
    )(h, w_flat, rw_flat, al, ar)


# ---------------------------------------------------------------------------
# Kernel 1b: masked edge-softmax + aggregation, tiled over destination nodes
#            scores built directly as e[dst_row, src_lane] -> no transpose
# ---------------------------------------------------------------------------
def _gat_attention_kernel(adjt_ref, elT_ref, er_ref, zh_ref, res_ref, b_ref,
                          out_ref, *, num_heads, out_feats, negative_slope):
    adjt = adjt_ref[...]                                       # [TN, N]  (dst, src)
    mask = adjt > 0.0
    zh_bf = zh_ref[...].astype(jnp.bfloat16)                   # [N, H*F]
    er = er_ref[...]                                           # [TN, H]
    outs = []
    for hd in range(num_heads):
        sl = slice(hd * out_feats, (hd + 1) * out_feats)
        e = elT_ref[hd:hd + 1, :] + er[:, hd:hd + 1]           # [TN, N]
        e = jnp.where(e > 0, e, negative_slope * e)            # leaky relu
        e = jnp.where(mask, e, -1e30)                          # mask non-edges
        e_max = jnp.max(e, axis=-1, keepdims=True)
        p = jnp.exp(e - e_max)       # masked entries underflow to exactly 0
        denom = jnp.sum(p, axis=-1, keepdims=True)             # >= 1 (self-loops)
        alpha = (p / denom).astype(jnp.bfloat16)               # [TN, N]
        # rst[v, f] = sum_u alpha[v, u] * zh[u, f]   (plain dot, MXU-friendly)
        outs.append(jnp.dot(alpha, zh_bf[:, sl],
                            preferred_element_type=jnp.float32))
    rst = jnp.concatenate(outs, axis=-1) + res_ref[...] + b_ref[...]
    out_ref[...] = jnp.maximum(rst, 0.0)                       # activation = relu


def gat_attention(adj_t, el_t, er, zh, res, b_flat, *, num_heads, out_feats,
                  dst_tile, negative_slope=0.2):
    Nd, Ns = adj_t.shape
    HF = num_heads * out_feats
    TN = _pick_tile(Nd, dst_tile)
    kern = functools.partial(_gat_attention_kernel, num_heads=num_heads,
                             out_feats=out_feats,
                             negative_slope=negative_slope)
    return pl.pallas_call(
        kern,
        grid=(Nd // TN,),
        out_shape=jax.ShapeDtypeStruct((Nd, HF), jnp.float32),
        in_specs=[pl.BlockSpec((TN, Ns), lambda j: (j, 0)),      # adj.T tile
                  pl.BlockSpec((num_heads, Ns), lambda j: (0, 0)),
                  pl.BlockSpec((TN, num_heads), lambda j: (j, 0)),
                  pl.BlockSpec((Ns, HF), lambda j: (0, 0)),
                  pl.BlockSpec((TN, HF), lambda j: (j, 0)),
                  pl.BlockSpec((1, HF), lambda j: (0, 0))],
        out_specs=pl.BlockSpec((TN, HF), lambda j: (j, 0)),
        compiler_params=_cparams(("parallel",)),
    )(adj_t, el_t, er, zh, res, b_flat)


# ---------------------------------------------------------------------------
# Kernel 2a: BatchNorm1d batch statistics (accumulator over a reduction grid)
# ---------------------------------------------------------------------------
def _bn_stats_kernel(h_ref, mean_ref, var_ref, *, n_rows):
    i = pl.program_id(0)

    @pl.when(i == 0)
    def _():
        mean_ref[...] = jnp.zeros_like(mean_ref)
        var_ref[...] = jnp.zeros_like(var_ref)

    h = h_ref[...]
    mean_ref[...] += jnp.sum(h, axis=0, keepdims=True)          # running sum
    var_ref[...] += jnp.sum(h * h, axis=0, keepdims=True)       # running sum sq

    @pl.when(i == pl.num_programs(0) - 1)
    def _():
        inv_n = 1.0 / n_rows
        m = mean_ref[...] * inv_n
        mean_ref[...] = m
        var_ref[...] = jnp.maximum(var_ref[...] * inv_n - m * m, 0.0)  # biased


def bn_stats(h, *, row_tile):
    N, D = h.shape
    TR = _pick_tile(N, row_tile)
    kern = functools.partial(_bn_stats_kernel, n_rows=float(N))
    return pl.pallas_call(
        kern,
        grid=(N // TR,),
        out_shape=(jax.ShapeDtypeStruct((1, D), jnp.float32),
                   jax.ShapeDtypeStruct((1, D), jnp.float32)),
        in_specs=[pl.BlockSpec((TR, D), lambda i: (i, 0))],
        out_specs=(pl.BlockSpec((1, D), lambda i: (0, 0)),
                   pl.BlockSpec((1, D), lambda i: (0, 0))),
        compiler_params=_cparams(("arbitrary",)),
    )(h)


# ---------------------------------------------------------------------------
# Kernel 2b: apply BatchNorm + node classifier fc, tiled over node rows
# ---------------------------------------------------------------------------
def _bn_fc_kernel(h_ref, mean_ref, var_ref, g_ref, b_ref, wfc_ref, bfc_ref,
                  hn_ref, pred_ref):
    hn = ((h_ref[...] - mean_ref[...]) * lax.rsqrt(var_ref[...] + 1e-5)
          * g_ref[...] + b_ref[...])
    hn_ref[...] = hn
    pred_ref[...] = (jnp.dot(hn, wfc_ref[...], preferred_element_type=jnp.float32)
                     + bfc_ref[...])


def bn_fc(h, mean, var, gamma, beta, wfc, bfc, *, row_tile):
    N, D = h.shape
    C = wfc.shape[1]
    TR = _pick_tile(N, row_tile)
    rep = lambda i: (0, 0)
    return pl.pallas_call(
        _bn_fc_kernel,
        grid=(N // TR,),
        out_shape=(jax.ShapeDtypeStruct((N, D), jnp.float32),
                   jax.ShapeDtypeStruct((N, C), jnp.float32)),
        in_specs=[pl.BlockSpec((TR, D), lambda i: (i, 0)),
                  pl.BlockSpec((1, D), rep), pl.BlockSpec((1, D), rep),
                  pl.BlockSpec((1, D), rep), pl.BlockSpec((1, D), rep),
                  pl.BlockSpec((D, C), rep), pl.BlockSpec((1, C), rep)],
        out_specs=(pl.BlockSpec((TR, D), lambda i: (i, 0)),
                   pl.BlockSpec((TR, C), lambda i: (i, 0))),
        compiler_params=_cparams(("parallel",)),
    )(h, mean, var, gamma, beta, wfc, bfc)


# ---------------------------------------------------------------------------
# Kernel 3: MLPPredictor_E2E, tiled over edge rows, fused (single) W1 matmul
# ---------------------------------------------------------------------------
def _edge_mlp_kernel(x_ref, w1_ref, b1_ref, g_ref, be_ref, w2_ref, b2_ref,
                     out_ref):
    t = (jnp.dot(x_ref[...].astype(jnp.bfloat16),
                 w1_ref[...].astype(jnp.bfloat16),
                 preferred_element_type=jnp.float32) + b1_ref[...])
    mean = jnp.mean(t, axis=-1, keepdims=True)
    var = jnp.mean((t - mean) ** 2, axis=-1, keepdims=True)
    tn = (t - mean) * lax.rsqrt(var + 1e-5) * g_ref[...] + be_ref[...]
    x = jnp.maximum(tn, 0.0)
    # dropout p = 0.0 -> identity
    out_ref[...] = (jnp.dot(x, w2_ref[...], preferred_element_type=jnp.float32)
                    + b2_ref[...])


def edge_mlp(xcat, w1, b1, ln_g, ln_b, w2, b2, *, edge_tile):
    E, K = xcat.shape
    Hd = w1.shape[1]
    O = w2.shape[1]
    TE = _pick_tile(E, edge_tile)
    rep = lambda i: (0, 0)
    return pl.pallas_call(
        _edge_mlp_kernel,
        grid=(E // TE,),
        out_shape=jax.ShapeDtypeStruct((E, O), jnp.float32),
        in_specs=[pl.BlockSpec((TE, K), lambda i: (i, 0)),
                  pl.BlockSpec((K, Hd), rep), pl.BlockSpec((1, Hd), rep),
                  pl.BlockSpec((1, Hd), rep), pl.BlockSpec((1, Hd), rep),
                  pl.BlockSpec((Hd, O), rep), pl.BlockSpec((1, O), rep)],
        out_specs=pl.BlockSpec((TE, O), lambda i: (i, 0)),
        compiler_params=_cparams(("parallel",)),
    )(xcat, w1, b1, ln_g, ln_b, w2, b2)


# ---------------------------------------------------------------------------
# full forward
# ---------------------------------------------------------------------------
def masked_gat_forward(params, x, adj, src, dst, polar, mask_flag, *,
                       node_tile=256, dst_tile=256, edge_tile=512):
    # encoding_mask_noise: out_x[mask]=0 then += token  == token on masked rows
    h = jnp.where(mask_flag[:, None], params['enc_mask_token'], x)
    adj_t = adj.T                                 # [dst, src] layout

    for layer in params['gat']:
        H, Din, F = layer['w'].shape
        HF = H * F
        w_flat = jnp.transpose(layer['w'], (1, 0, 2)).reshape(Din, HF)
        al_flat = layer['al'].reshape(1, HF)
        ar_flat = layer['ar'].reshape(1, HF)
        b_flat = layer['b'].reshape(1, HF)
        res_id = bool(layer.get('residual_identity', False))
        if res_id:
            assert Din == HF
            rw_flat = w_flat                      # ignored in the kernel
        else:
            rw_flat = jnp.transpose(layer['rw'], (1, 0, 2)).reshape(Din, HF)
        zh, res, el, er = gat_transform(h, w_flat, rw_flat, al_flat, ar_flat,
                                        num_heads=H, out_feats=F,
                                        residual_identity=res_id,
                                        row_tile=node_tile)
        el_t = el.T                               # [H, N] lane-dense rows
        h = gat_attention(adj_t, el_t, er, zh, res, b_flat,
                          num_heads=H, out_feats=F, dst_tile=dst_tile)

    mean, var = bn_stats(h, row_tile=node_tile)
    hn, preds = bn_fc(h, mean, var, params['bn_gamma'], params['bn_beta'],
                      params['fc_w'], params['fc_b'], row_tile=node_tile)

    # edge feature assembly (gather + softmax + concat) kept as XLA glue.
    # TODO(synk): move the hn[src]/hn[dst] gathers into the edge kernel via
    # scalar-prefetched indices + in-kernel DMA to avoid the E x D round trip.
    sm = jax.nn.softmax(preds, axis=-1)
    xcat = jnp.concatenate([hn[src], sm[src], polar, hn[dst], sm[dst]], axis=-1)
    ep = params['edge']
    w1 = jnp.concatenate([ep['w_hu'], ep['w_cu'], ep['w_p'],
                          ep['w_hv'], ep['w_cv']], axis=0)
    pred_edges = edge_mlp(xcat, w1, ep['b1'], ep['ln_g'], ep['ln_b'],
                          ep['w2'], ep['b2'], edge_tile=edge_tile)
    return preds, pred_edges


# ---------------------------------------------------------------------------
# pure-JAX f32 reference of the same module math (sanity check)
# ---------------------------------------------------------------------------
def reference_forward(params, x, adj, src, dst, polar, mask_flag, neg_slope=0.2):
    h = jnp.where(mask_flag[:, None], params['enc_mask_token'], x)
    for layer in params['gat']:
        H = layer['w'].shape[0]
        outs = []
        for hd in range(H):
            zh = h @ layer['w'][hd]
            el = (zh * layer['al'][hd]).sum(-1, keepdims=True)
            er = (zh * layer['ar'][hd]).sum(-1, keepdims=True)
            e = el + er.T
            e = jnp.where(e > 0, e, neg_slope * e)
            e = jnp.where(adj > 0, e, -1e30)
            p = jnp.exp(e - e.max(0, keepdims=True))
            p = jnp.where(adj > 0, p, 0.0)
            alpha = p / jnp.maximum(p.sum(0, keepdims=True), 1e-20)
            rst = alpha.T @ zh + h @ layer['rw'][hd] + layer['b'][hd]
            outs.append(jnp.maximum(rst, 0.0))
        h = jnp.concatenate(outs, axis=1)
    mean = h.mean(0, keepdims=True)
    var = ((h - mean) ** 2).mean(0, keepdims=True)
    hn = (h - mean) / jnp.sqrt(var + 1e-5) * params['bn_gamma'] + params['bn_beta']
    preds = hn @ params['fc_w'] + params['fc_b']
    ep = params['edge']
    sm = lambda z: jax.nn.softmax(z, axis=-1)
    t = (hn[src] @ ep['w_hu'] + sm(preds[src]) @ ep['w_cu'] + polar @ ep['w_p']
         + hn[dst] @ ep['w_hv'] + sm(preds[dst]) @ ep['w_cv'] + ep['b1'])
    mean = t.mean(-1, keepdims=True)
    var = ((t - mean) ** 2).mean(-1, keepdims=True)
    tn = (t - mean) / jnp.sqrt(var + 1e-5) * ep['ln_g'] + ep['ln_b']
    score = jnp.maximum(tn, 0.0) @ ep['w2'] + ep['b2']
    return preds, score


# ---------------------------------------------------------------------------
# main
# ---------------------------------------------------------------------------
if __name__ == "__main__":
    N = 64            # nodes (multi-tile grids at tile=32)
    IN_DIM = 8
    HID = 8           # GAT hidden_dim (per head)
    HEADS = 2
    LAYERS = 2
    D = HID * HEADS   # 16
    NODE_CLASSES = 4
    POLAR = 2
    EDGE_HID = 16
    EDGE_OUT = 3
    MASK_RATE = 0.2
    DEG = 4           # incoming edges per node (incl. self-loop)

    key = jax.random.PRNGKey(0)
    ks = list(jax.random.split(key, 24))

    def nrm(k, shape, scale=0.1):
        return scale * jax.random.normal(k, shape, jnp.float32)

    # GAT layer 0 (in=IN_DIM != HEADS*HID -> residual Linear)
    layer0 = dict(
        w=nrm(ks[0], (HEADS, IN_DIM, HID)),
        al=nrm(ks[1], (HEADS, 1, HID)),
        ar=nrm(ks[2], (HEADS, 1, HID)),
        b=jnp.zeros((HEADS, 1, HID), jnp.float32),
        rw=nrm(ks[3], (HEADS, IN_DIM, HID)),
        residual_identity=False,
    )
    # GAT layer 1 (in=D == HEADS*HID -> residual Identity)
    eye = jnp.eye(D, dtype=jnp.float32)
    layer1 = dict(
        w=nrm(ks[4], (HEADS, D, HID)),
        al=nrm(ks[5], (HEADS, 1, HID)),
        ar=nrm(ks[6], (HEADS, 1, HID)),
        b=jnp.zeros((HEADS, 1, HID), jnp.float32),
        rw=jnp.stack([eye[:, hd * HID:(hd + 1) * HID] for hd in range(HEADS)]),
        residual_identity=True,
    )

    params = dict(
        enc_mask_token=jnp.zeros((1, IN_DIM), jnp.float32),   # per __init__
        gat=[layer0, layer1][:LAYERS],
        bn_gamma=jnp.ones((1, D), jnp.float32),
        bn_beta=jnp.zeros((1, D), jnp.float32),
        fc_w=nrm(ks[7], (D, NODE_CLASSES)),
        fc_b=nrm(ks[8], (1, NODE_CLASSES), 0.01),
        edge=dict(
            w_hu=nrm(ks[9], (D, EDGE_HID)),
            w_cu=nrm(ks[10], (NODE_CLASSES, EDGE_HID)),
            w_p=nrm(ks[11], (POLAR, EDGE_HID)),
            w_hv=nrm(ks[12], (D, EDGE_HID)),
            w_cv=nrm(ks[13], (NODE_CLASSES, EDGE_HID)),
            b1=nrm(ks[14], (1, EDGE_HID), 0.01),
            ln_g=jnp.ones((1, EDGE_HID), jnp.float32),
            ln_b=jnp.zeros((1, EDGE_HID), jnp.float32),
            w2=nrm(ks[15], (EDGE_HID, EDGE_OUT)),
            b2=nrm(ks[16], (1, EDGE_OUT), 0.01),
        ),
    )

    # deterministic graph: every dst node has DEG incoming edges incl. self-loop
    offsets = jnp.array([0, 1, 3, 5], dtype=jnp.int32)
    dst = jnp.repeat(jnp.arange(N, dtype=jnp.int32), DEG)
    src = (dst + jnp.tile(offsets, N)) % N
    E = int(src.shape[0])                                     # 256
    adj = jnp.zeros((N, N), jnp.float32).at[src, dst].set(1.0)

    x = jax.random.normal(ks[17], (N, IN_DIM), jnp.float32)
    polar = jax.random.normal(ks[18], (E, POLAR), jnp.float32)

    # encoding_mask_noise randomness (torch.randperm -> jax.random.permutation)
    perm = jax.random.permutation(ks[19], N)
    num_mask = int(MASK_RATE * N)
    mask_flag = jnp.zeros((N,), bool).at[perm[:num_mask]].set(True)

    preds, pred_edges = masked_gat_forward(
        params, x, adj, src, dst, polar, mask_flag,
        node_tile=32, dst_tile=32, edge_tile=64)
    preds = jax.block_until_ready(preds)
    pred_edges = jax.block_until_ready(pred_edges)

    # sanity check against the pure-JAX f32 reference (kernel uses bf16 MXU
    # operands for the big matmuls, so tolerances are loose but meaningful)
    r_preds, r_edges = reference_forward(params, x, adj, src, dst, polar, mask_flag)
    assert preds.shape == (N, NODE_CLASSES) and pred_edges.shape == (E, EDGE_OUT)
    assert bool(jnp.all(jnp.isfinite(preds))) and bool(jnp.all(jnp.isfinite(pred_edges)))
    assert jnp.allclose(preds, r_preds, atol=3e-2, rtol=3e-2)
    assert jnp.allclose(pred_edges, r_edges, atol=5e-2, rtol=5e-2)

    print("KERNEL_OK")
</pallas_src>

<mosaic_0001>
module attributes {stable_mosaic.version = 11 : i64} {
  func.func @_gat_transform_kernel(%arg0: i32, %arg1: memref<32x8xf32, #tpu.memory_space<vmem>>, %arg2: memref<8x16xf32, #tpu.memory_space<vmem>>, %arg3: memref<8x16xf32, #tpu.memory_space<vmem>>, %arg4: memref<1x16xf32, #tpu.memory_space<vmem>>, %arg5: memref<1x16xf32, #tpu.memory_space<vmem>>, %arg6: memref<32x16xf32, #tpu.memory_space<vmem>>, %arg7: memref<32x16xf32, #tpu.memory_space<vmem>>, %arg8: memref<32x2xf32, #tpu.memory_space<vmem>>, %arg9: memref<32x2xf32, #tpu.memory_space<vmem>>) attributes {dimension_semantics = [#tpu.dimension_semantics<parallel>], iteration_bounds = array<i64: 2>, scalar_prefetch = 0 : i64, scratch_operands = 0 : i64, tpu.core_type = #tpu.core_type<tc>, window_params = [{transform_indices = @transform_0, window_bounds = array<i64: 32, 8>}, {pipeline_mode = #tpu.pipeline_mode<synchronous>, transform_indices = @transform_1, window_bounds = array<i64: 8, 16>}, {pipeline_mode = #tpu.pipeline_mode<synchronous>, transform_indices = @transform_2, window_bounds = array<i64: 8, 16>}, {pipeline_mode = #tpu.pipeline_mode<synchronous>, transform_indices = @transform_3, window_bounds = array<i64: 1, 16>}, {pipeline_mode = #tpu.pipeline_mode<synchronous>, transform_indices = @transform_4, window_bounds = array<i64: 1, 16>}, {transform_indices = @transform_5, window_bounds = array<i64: 32, 16>}, {transform_indices = @transform_6, window_bounds = array<i64: 32, 16>}, {transform_indices = @transform_7, window_bounds = array<i64: 32, 2>}, {transform_indices = @transform_8, window_bounds = array<i64: 32, 2>}]} {
    %c0 = arith.constant 0 : index
    %c0_0 = arith.constant 0 : index
    %0 = vector.load %arg1[%c0, %c0_0] : memref<32x8xf32, #tpu.memory_space<vmem>>, vector<32x8xf32>
    %c0_1 = arith.constant 0 : index
    %c0_2 = arith.constant 0 : index
    %1 = vector.load %arg2[%c0_1, %c0_2] : memref<8x16xf32, #tpu.memory_space<vmem>>, vector<8x16xf32>
    %cst = arith.constant dense<0.000000e+00> : vector<32x16xf32>
    %2 = tpu.matmul %0, %1, %cst {dimension_numbers = #tpu.dot_dimension_numbers<[1], [0], [0], [1], [0, 0, 1, 1], [], []>} : vector<32x8xf32>, vector<8x16xf32>, vector<32x16xf32> -> vector<32x16xf32>
    %c0_3 = arith.constant 0 : index
    %c0_4 = arith.constant 0 : index
    %3 = vector.load %arg6[%c0_3, %c0_4] : memref<32x16xf32, #tpu.memory_space<vmem>>, vector<32x16xf32>
    tpu.vector_store %arg6[%c0_3, %c0_4], %2 {strides = array<i32>} : memref<32x16xf32, #tpu.memory_space<vmem>>, vector<32x16xf32>,
    %c0_5 = arith.constant 0 : index
    %c0_6 = arith.constant 0 : index
    %4 = vector.load %arg3[%c0_5, %c0_6] : memref<8x16xf32, #tpu.memory_space<vmem>>, vector<8x16xf32>
    %cst_7 = arith.constant dense<0.000000e+00> : vector<32x16xf32>
    %5 = tpu.matmul %0, %4, %cst_7 {dimension_numbers = #tpu.dot_dimension_numbers<[1], [0], [0], [1], [0, 0, 1, 1], [], []>} : vector<32x8xf32>, vector<8x16xf32>, vector<32x16xf32> -> vector<32x16xf32>
    %c0_8 = arith.constant 0 : index
    %c0_9 = arith.constant 0 : index
    %6 = vector.load %arg7[%c0_8, %c0_9] : memref<32x16xf32, #tpu.memory_space<vmem>>, vector<32x16xf32>
    tpu.vector_store %arg7[%c0_8, %c0_9], %5 {strides = array<i32>} : memref<32x16xf32, #tpu.memory_space<vmem>>, vector<32x16xf32>,
    %c0_10 = arith.constant 0 : index
    %c0_11 = arith.constant 0 : index
    %7 = vector.load %arg4[%c0_10, %c0_11] : memref<1x16xf32, #tpu.memory_space<vmem>>, vector<1x16xf32>
    %c0_12 = arith.constant 0 : index
    %c0_13 = arith.constant 0 : index
    %8 = vector.load %arg5[%c0_12, %c0_13] : memref<1x16xf32, #tpu.memory_space<vmem>>, vector<1x16xf32>
    %9 = vector.extract_strided_slice %2 {offsets = [0, 0], sizes = [32, 8], strides = [1, 1]} : vector<32x16xf32> to vector<32x8xf32>
    %10 = vector.extract_strided_slice %7 {offsets = [0, 0], sizes = [1, 8], strides = [1, 1]} : vector<1x16xf32> to vector<1x8xf32>
    %11 = vector.broadcast %10 : vector<1x8xf32> to vector<32x8xf32>
    %12 = arith.mulf %9, %11 : vector<32x8xf32>
    %cst_14 = arith.constant dense<0.000000e+00> : vector<32xf32>
    %13 = vector.multi_reduction <add>, %12, %cst_14 [1] : vector<32x8xf32> to vector<32xf32>
    %14 = vector.shape_cast %13 : vector<32xf32> to vector<32x1xf32>
    %15 = vector.extract_strided_slice %8 {offsets = [0, 0], sizes = [1, 8], strides = [1, 1]} : vector<1x16xf32> to vector<1x8xf32>
    %16 = vector.broadcast %15 : vector<1x8xf32> to vector<32x8xf32>
    %17 = arith.mulf %9, %16 : vector<32x8xf32>
    %cst_15 = arith.constant dense<0.000000e+00> : vector<32xf32>
    %18 = vector.multi_reduction <add>, %17, %cst_15 [1] : vector<32x8xf32> to vector<32xf32>
    %19 = vector.shape_cast %18 : vector<32xf32> to vector<32x1xf32>
    %20 = vector.extract_strided_slice %2 {offsets = [0, 8], sizes = [32, 8], strides = [1, 1]} : vector<32x16xf32> to vector<32x8xf32>
    %21 = vector.extract_strided_slice %7 {offsets = [0, 8], sizes = [1, 8], strides = [1, 1]} : vector<1x16xf32> to vector<1x8xf32>
    %22 = vector.broadcast %21 : vector<1x8xf32> to vector<32x8xf32>
    %23 = arith.mulf %20, %22 : vector<32x8xf32>
    %cst_16 = arith.constant dense<0.000000e+00> : vector<32xf32>
    %24 = vector.multi_reduction <add>, %23, %cst_16 [1] : vector<32x8xf32> to vector<32xf32>
    %25 = vector.shape_cast %24 : vector<32xf32> to vector<32x1xf32>
    %26 = vector.extract_strided_slice %8 {offsets = [0, 8], sizes = [1, 8], strides = [1, 1]} : vector<1x16xf32> to vector<1x8xf32>
    %27 = vector.broadcast %26 : vector<1x8xf32> to vector<32x8xf32>
    %28 = arith.mulf %20, %27 : vector<32x8xf32>
    %cst_17 = arith.constant dense<0.000000e+00> : vector<32xf32>
    %29 = vector.multi_reduction <add>, %28, %cst_17 [1] : vector<32x8xf32> to vector<32xf32>
    %30 = vector.shape_cast %29 : vector<32xf32> to vector<32x1xf32>
    %31 = tpu.concatenate %14, %25 in 1 : vector<32x1xf32>, vector<32x1xf32> -> vector<32x2xf32>
    %c0_18 = arith.constant 0 : index
    %c0_19 = arith.constant 0 : index
    %32 = vector.load %arg8[%c0_18, %c0_19] : memref<32x2xf32, #tpu.memory_space<vmem>>, vector<32x2xf32>
    tpu.vector_store %arg8[%c0_18, %c0_19], %31 {strides = array<i32>} : memref<32x2xf32, #tpu.memory_space<vmem>>, vector<32x2xf32>,
    %33 = tpu.concatenate %19, %30 in 1 : vector<32x1xf32>, vector<32x1xf32> -> vector<32x2xf32>
    %c0_20 = arith.constant 0 : index
    %c0_21 = arith.constant 0 : index
    %34 = vector.load %arg9[%c0_20, %c0_21] : memref<32x2xf32, #tpu.memory_space<vmem>>, vector<32x2xf32>
    tpu.vector_store %arg9[%c0_20, %c0_21], %33 {strides = array<i32>} : memref<32x2xf32, #tpu.memory_space<vmem>>, vector<32x2xf32>,
    return
  }
  func.func @transform_0(%arg0: i32) -> (i32, i32) {
    %c0_i32 = arith.constant 0 : i32
    %c0_i32_0 = arith.constant 0 : i32
    return %arg0, %c0_i32 : i32, i32
  }
  func.func @transform_1(%arg0: i32) -> (i32, i32) {
    %c0_i32 = arith.constant 0 : i32
    %c0_i32_0 = arith.constant 0 : i32
    %c0_i32_1 = arith.constant 0 : i32
    return %c0_i32, %c0_i32_0 : i32, i32
  }
  func.func @transform_2(%arg0: i32) -> (i32, i32) {
    %c0_i32 = arith.constant 0 : i32
    %c0_i32_0 = arith.constant 0 : i32
    %c0_i32_1 = arith.constant 0 : i32
    return %c0_i32, %c0_i32_0 : i32, i32
  }
  func.func @transform_3(%arg0: i32) -> (i32, i32) {
    %c0_i32 = arith.constant 0 : i32
    %c0_i32_0 = arith.constant 0 : i32
    %c0_i32_1 = arith.constant 0 : i32
    return %c0_i32, %c0_i32_0 : i32, i32
  }
  func.func @transform_4(%arg0: i32) -> (i32, i32) {
    %c0_i32 = arith.constant 0 : i32
    %c0_i32_0 = arith.constant 0 : i32
    %c0_i32_1 = arith.constant 0 : i32
    return %c0_i32, %c0_i32_0 : i32, i32
  }
  func.func @transform_5(%arg0: i32) -> (i32, i32) {
    %c0_i32 = arith.constant 0 : i32
    %c0_i32_0 = arith.constant 0 : i32
    return %arg0, %c0_i32 : i32, i32
  }
  func.func @transform_6(%arg0: i32) -> (i32, i32) {
    %c0_i32 = arith.constant 0 : i32
    %c0_i32_0 = arith.constant 0 : i32
    return %arg0, %c0_i32 : i32, i32
  }
  func.func @transform_7(%arg0: i32) -> (i32, i32) {
    %c0_i32 = arith.constant 0 : i32
    %c0_i32_0 = arith.constant 0 : i32
    return %arg0, %c0_i32 : i32, i32
  }
  func.func @transform_8(%arg0: i32) -> (i32, i32) {
    %c0_i32 = arith.constant 0 : i32
    %c0_i32_0 = arith.constant 0 : i32
    return %arg0, %c0_i32 : i32, i32
  }
}

</mosaic_0001>

<bundles_post_ra>
// kernel: tpu_custom_call.1
= control target key start
LH: loop header
LB: loop body
LE: loop exit
PB: predicated region body
PF: predicated region fallthrough
CT: control target
= control target key end

     0   :  { %s941_s27 = smov 0   ;;  %s1034_s0 = inlined_call_operand.vmem [shape: f32[64,8], index: 0, kind: input, shape index: {}]   ;;  %s1035_s1 = inlined_call_operand.vmem [shape: f32[8,16], index: 1, kind: input, shape index: {}]   ;;  %s1036_s2 = inlined_call_operand.vmem [shape: f32[8,16], index: 2, kind: input, shape index: {}]   ;;  %s1037_s3 = inlined_call_operand.vmem [shape: f32[1,16], index: 3, kind: input, shape index: {}]   ;;  %s1038_s4 = inlined_call_operand.vmem [shape: f32[1,16], index: 4, kind: input, shape index: {}]   ;;  %s1039_s5 = inlined_call_operand.vmem [shape: f32[64,16], index: 5, kind: output, shape index: {0}]   ;;  %s1040_s6 = inlined_call_operand.vmem [shape: f32[64,16], index: 6, kind: output, shape index: {1}]   ;;  %s1041_s7 = inlined_call_operand.vmem [shape: f32[64,2], index: 7, kind: output, shape index: {2}]   ;;  %s1042_s8 = inlined_call_operand.vmem [shape: f32[64,2], index: 8, kind: output, shape index: {3}]  }
   0x1 LB: > { %s825_s28 = sadd.s32 4294967295, %s893_s27   ;;  %p829_p0 = scmp.ge.s32.totalorder %s893_s27, 1  ;;  %s893_s27 = sphi %s941_s27, %s19_s27  }
   0x2   : > { %p270_p1 = scmp.lt.s32.totalorder %s893_s27, 3 }
   0x4   : > { %p271_p2 = pnand %p829_p0, %p270_p1 }
   0x5   : > { %v353_v0 = vld [vmem:[%s1035_s1] sm:$0xff] (!%p271_p2)  ;;  %s830_s9 = sshll.u32 (!%p271_p2), %s825_s28, 2  ;;  %vm354_vm0 = vcmask (!%p271_p2), 64512   ;;  %vm452_vm1 = vcmask (!%p271_p2), 130048   ;;  %s895_s23 = smov (!%p271_p2), 120   ;;  %vm649_vm2 = vcmask (!%p271_p2), 7168  }
   0x6   : > { %274 = sbr.rel (%p271_p2) target bundleno = 512 (0x200), region = 40  ;;  %862 = vmatprep.subr.mxu0 (!%p271_p2), %v353_v0  ;;  %p320_p3 = scmp.lt.s32.totalorder (!%p271_p2), %s830_s9, 7  ;;  %v457_v5 = vld [vmem:[%s1036_s2] sm:$0xff] (!%p271_p2)  ;;  %vm654_vm3 = vcmask (!%p271_p2), 15360  }
   0x7   : > { %863 = vmatpush3.msra.mxu0 (!%p271_p2), %v353_v0  ;;  %870 = vmatprep.subr.mxu1 (!%p271_p2), %v457_v5  ;;  %v848_v6 = vld [vmem:[%s1037_s3] ss:$0 sm:$0xff] (!%p271_p2) }
   0x8   : > { %871 = vmatpush3.msra.mxu1 (!%p271_p2), %v457_v5  ;;  %v849_v10 = vld [vmem:[%s1038_s4] ss:$0 sm:$0xff] (!%p271_p2) }
   0xd   : > { %s1044_s9 = smov (!%p320_p3, %s830_s9), 7 }
   0xe   : > { %s952_s10 = sshll.u32 %s1044_s9, 3 }
   0xf   : > { %s323_s13 = scalar_lea.vmem %s1034_s0, %s952_s10  ;;  %s329_s20 = scalar_lea.vmem %s1039_s5, %s952_s10 }
  0x10   : > { %v349_v1 = vld [vmem:[%s323_s13] sm:$0xff]  ;;  %v350_v2 = vld [vmem:[%s323_s13 + $0x8] sm:$0xff]  ;;  %v351_v3 = vld [vmem:[%s323_s13 + $0x10] sm:$0xff]  ;;  %s335_s26 = scalar_lea.vmem %s1040_s6, %s952_s10  ;;  %s341_s30 = scalar_lea.vmem %s1041_s7, %s952_s10 }
  0x11   : > { %864 = vmatprep.mubr.msk.f32.mxu0 %vm354_vm0, %v349_v1  ;;  %872 = vmatprep.mubr.msk.f32.mxu1 %vm354_vm0, %v349_v1  ;;  %v352_v4 = vld [vmem:[%s323_s13 + $0x18] sm:$0xff]  ;;  %s347_s12 = scalar_lea.vmem %s1042_s8, %s952_s10 }
  0x12   : > { %865 = vmatmul.mubr.msk.f32.vlgmr.msra.gmra.mrb[0].mxu0 %vm354_vm0, %v350_v2  ;;  %873 = vmatmul.mubr.msk.f32.vlgmr.msra.gmra.mrb[0].mxu1 %vm354_vm0, %v350_v2 }
  0x13   : > { %867 = vmatprep.mubr.msk.f32.mxu0 %vm354_vm0, %v351_v3  ;;  %875 = vmatprep.mubr.msk.f32.mxu1 %vm354_vm0, %v351_v3 }
  0x16   : > { %868 = vmatmul.mubr.msk.f32.gmra.mrb[2].mxu0 %vm354_vm0, %v352_v4  ;;  %876 = vmatmul.mubr.msk.f32.gmra.mrb[2].mxu1 %vm354_vm0, %v352_v4 }
  0xe5   : > { %v866_v7 = vpop.f32.mrb[0].mxu0  ;;  %v874_v44 = vpop.f32.mrb[0].mxu1 }
  0xe6   : > { %v433_v8 = vpop.f32.mrb[1].mxu0  ;;  %v556_v9 = vmul.f32 %v866_v7, %v848_v6  ;;  %454 = vst.msk [vmem:[%s329_s20 + $0x8] sm:$0xff] %vm452_vm1, %v866_v7  ;;  %v578_v13 = vmul.f32 %v866_v7, %v849_v10  ;;  %v524_v45 = vpop.f32.mrb[1].mxu1  ;;  %544 = vst.msk [vmem:[%s335_s26 + $0x8] sm:$0xff] %vm452_vm1, %v874_v44 }
  0xe7   : > { %453 = vst.msk [vmem:[%s329_s20] sm:$0xff] %vm452_vm1, %v433_v8  ;;  %v555_v11 = vmul.f32 %v848_v6, %v433_v8  ;;  %v577_v15 = vmul.f32 %v849_v10, %v433_v8  ;;  %543 = vst.msk [vmem:[%s335_s26] sm:$0xff] %vm452_vm1, %v524_v45 }
  0xe8   : > { %599 = vrot.lane.b32.xlu1 %v556_v9, %s895_s23  ;;  %v584_v22 = vsel %vm354_vm0, %v578_v13, 0.0  ;;  %v562_v23 = vsel %vm354_vm0, %v556_v9, 0.0 }
  0xe9   : > { %597 = vrot.lane.b32.xlu0 %v555_v11, %s895_s23  ;;  %v869_v12 = vpop.f32.mrb[2].mxu0  ;;  %v559_v20 = vsel %vm354_vm0, %v555_v11, 0.0  ;;  %v581_v21 = vsel %vm354_vm0, %v577_v15, 0.0  ;;  %v877_v46 = vpop.f32.mrb[2].mxu1 }
  0xea   : > { %v443_v14 = vpop.f32.mrb[3].mxu0  ;;  %456 = vst.msk [vmem:[%s329_s20 + $0x18] sm:$0xff] %vm452_vm1, %v869_v12  ;;  %v580_v18 = vmul.f32 %v869_v12, %v849_v10  ;;  %v558_v19 = vmul.f32 %v869_v12, %v848_v6  ;;  %v534_v47 = vpop.f32.mrb[3].mxu1  ;;  %546 = vst.msk [vmem:[%s335_s26 + $0x18] sm:$0xff] %vm452_vm1, %v877_v46 }
  0xeb   : > { %455 = vst.msk [vmem:[%s329_s20 + $0x10] sm:$0xff] %vm452_vm1, %v443_v14  ;;  %v579_v16 = vmul.f32 %v849_v10, %v443_v14  ;;  %v557_v17 = vmul.f32 %v848_v6, %v443_v14  ;;  %545 = vst.msk [vmem:[%s335_s26 + $0x10] sm:$0xff] %vm452_vm1, %v534_v47 }
  0xec   : > { %627 = vrot.lane.b32.xlu1 %v578_v13, %s895_s23  ;;  %v590_v24 = vsel %vm354_vm0, %v580_v18, 0.0  ;;  %v568_v25 = vsel %vm354_vm0, %v558_v19, 0.0 }
  0xed   : > { %625 = vrot.lane.b32.xlu0 %v577_v15, %s895_s23  ;;  %v587_v26 = vsel %vm354_vm0, %v579_v16, 0.0  ;;  %v565_v27 = vsel %vm354_vm0, %v557_v17, 0.0 }
  0xf0   : > { %629 = vrot.lane.b32.xlu1 %v579_v16, %s895_s23 }
  0xf1   : > { %601 = vrot.lane.b32.xlu0 %v557_v17, %s895_s23 }
  0xf4   : > { %631 = vrot.lane.b32.xlu1 %v580_v18, %s895_s23 }
  0xf5   : > { %603 = vrot.lane.b32.xlu0 %v558_v19, %s895_s23 }
 0x114   : > { %560 = vadd.xlane.f32.xlu0 %v559_v20 }
 0x118   : > { %582 = vadd.xlane.f32.xlu1 %v581_v21  ;;  %585 = vadd.xlane.f32.xlu0 %v584_v22 }
 0x11c   : > { %563 = vadd.xlane.f32.xlu1 %v562_v23  ;;  %591 = vadd.xlane.f32.xlu0 %v590_v24 }
 0x120   : > { %569 = vadd.xlane.f32.xlu1 %v568_v25  ;;  %588 = vadd.xlane.f32.xlu0 %v587_v26 }
 0x124   : > { %566 = vadd.xlane.f32.xlu1 %v565_v27 }
 0x15a   : > { %v600_v28 = vpop.permute.xlu1 %599 }
 0x15b   : > { %v598_v29 = vpop.permute.xlu0 %597  ;;  %v612_v30 = vsel %vm354_vm0, %v600_v28, 0.0 }
 0x15c   : > { %613 = vadd.xlane.f32.xlu1 %v612_v30  ;;  %v609_v35 = vsel %vm354_vm0, %v598_v29, 0.0 }
 0x15e   : > { %v628_v31 = vpop.permute.xlu1 %627 }
 0x15f   : > { %v626_v32 = vpop.permute.xlu0 %625  ;;  %v640_v33 = vsel %vm354_vm0, %v628_v31, 0.0 }
 0x160   : > { %641 = vadd.xlane.f32.xlu0 %v640_v33  ;;  %v637_v39 = vsel %vm354_vm0, %v626_v32, 0.0 }
 0x162   : > { %v630_v37 = vpop.permute.xlu1 %629 }
 0x163   : > { %v602_v34 = vpop.permute.xlu0 %601  ;;  %v643_v41 = vsel %vm354_vm0, %v630_v37, 0.0 }
 0x164   : > { %610 = vadd.xlane.f32.xlu0 %v609_v35  ;;  %v615_v36 = vsel %vm354_vm0, %v602_v34, 0.0 }
 0x165   : > { %616 = vadd.xlane.f32.xlu1 %v615_v36 }
 0x166   : > { %v632_v42 = vpop.permute.xlu1 %631 }
 0x167   : > { %v604_v38 = vpop.permute.xlu0 %603  ;;  %v646_v43 = vsel %vm354_vm0, %v632_v42, 0.0 }
 0x168   : > { %638 = vadd.xlane.f32.xlu0 %v637_v39  ;;  %v618_v40 = vsel %vm354_vm0, %v604_v38, 0.0 }
 0x169   : > { %619 = vadd.xlane.f32.xlu1 %v618_v40 }
 0x16c   : > { %644 = vadd.xlane.f32.xlu0 %v643_v41 }
 0x170   : > { %647 = vadd.xlane.f32.xlu0 %v646_v43 }
 0x1a1   : > { %v561_v48 = vpop.xlane.xlu0 %560 }
 0x1a5   : > { %v583_v49 = vpop.xlane.xlu1 %582  ;;  %v586_v50 = vpop.xlane.xlu0 %585 }
 0x1a9   : > { %v564_v51 = vpop.xlane.xlu1 %563  ;;  %v592_v52 = vpop.xlane.xlu0 %591 }
 0x1ad   : > { %v570_v53 = vpop.xlane.xlu1 %569  ;;  %v589_v54 = vpop.xlane.xlu0 %588 }
 0x1b1   : > { %v567_v55 = vpop.xlane.xlu1 %566 }
 0x1e9   : > { %v614_v57 = vpop.xlane.xlu1 %613 }
 0x1ea   : > { %v651_v61 = vsel %vm649_vm2, %v564_v51, %v614_v57 }
 0x1eb   : > { %656 = vst.msk [vmem:[%s341_s30 + $0x8] sm:$0xff] %vm654_vm3, %v651_v61 }
 0x1ed   : > { %v642_v56 = vpop.xlane.xlu0 %641 }
 0x1ee   : > { %v660_v2 = vsel %vm649_vm2, %v586_v50, %v642_v56 }
 0x1ef   : > { %664 = vst.msk [vmem:[%s347_s12 + $0x8] sm:$0xff] %vm654_vm3, %v660_v2 }
 0x1f1   : > { %v611_v58 = vpop.xlane.xlu0 %610 }
 0x1f2   : > { %v650_v59 = vsel %vm649_vm2, %v561_v48, %v611_v58  ;;  %v617_v60 = vpop.xlane.xlu1 %616 }
 0x1f3   : > { %655 = vst.msk [vmem:[%s341_s30] sm:$0xff] %vm654_vm3, %v650_v59  ;;  %v652_v62 = vsel %vm649_vm2, %v567_v55, %v617_v60 }
 0x1f4   : > { %657 = vst.msk [vmem:[%s341_s30 + $0x10] sm:$0xff] %vm654_vm3, %v652_v62 }
 0x1f5   : > { %v639_v63 = vpop.xlane.xlu0 %638 }
 0x1f6   : > { %v659_v0 = vsel %vm649_vm2, %v583_v49, %v639_v63  ;;  %v620_v1 = vpop.xlane.xlu1 %619 }
 0x1f7   : > { %663 = vst.msk [vmem:[%s347_s12] sm:$0xff] %vm654_vm3, %v659_v0  ;;  %v653_v3 = vsel %vm649_vm2, %v570_v53, %v620_v1 }
 0x1f8   : > { %658 = vst.msk [vmem:[%s341_s30 + $0x18] sm:$0xff] %vm654_vm3, %v653_v3 }
 0x1f9   : > { %v645_v4 = vpop.xlane.xlu0 %644 }
 0x1fa   : > { %v661_v5 = vsel %vm649_vm2, %v589_v54, %v645_v4 }
 0x1fb   : > { %665 = vst.msk [vmem:[%s347_s12 + $0x10] sm:$0xff] %vm654_vm3, %v661_v5 }
 0x1fd   : > { %v648_v6 = vpop.xlane.xlu0 %647 }
 0x1fe   : > { %v662_v7 = vsel %vm649_vm2, %v592_v52, %v648_v6 }
 0x1ff   : > { %666 = vst.msk [vmem:[%s347_s12 + $0x18] sm:$0xff] %vm654_vm3, %v662_v7 }
 0x200 PF: > { %s19_s27 = sadd.s32 1, %s893_s27  }
 0x201   : > { %p16_p4 = scmp.ge.s32.totalorder %s19_s27, 4  }
 0x203   :  { %18 = sbr.rel (!%p16_p4) target bundleno = 1 (0x1), region = 106 }

</bundles_post_ra>
